<compile_context>
chip_gen: v7x
topology: tpu7x:2x2x1
jax: 0.10.0
libtpu: 0.0.40
codegen_flags: <defaults>
</compile_context>

<pallas_src>
import math

import jax
import jax.numpy as jnp
from jax.experimental import pallas as pl
from jax.experimental.pallas import tpu as pltpu


# ---------------------------------------------------------------------------
# Kernel
# ---------------------------------------------------------------------------

def att_kernel(q_ref, keys_ref,
               wq_ref, bq_ref,        # (U, 2U), (1, 2U)  -- pre-scaled, zero V half
               wkv_ref, bkv_ref,      # (U, 2U), (1, 2U)  -- packed [Wk | Wv]
               wfc_ref, wfq_ref,      # (2U, U), (U, U)   -- fuse weight split (ctx / query)
               bf_ref,                # (1, U)
               o_ref):
    q = q_ref[...]                                   # (TB, U)
    keys = keys_ref[...]                             # (TB, T, U)
    TB, T, U = keys.shape
    U2 = wkv_ref.shape[1]                            # 2U

    # --- Q projection (pre-scaled by 1/sqrt(U); V half of the packed weight is zero)
    qp = jnp.dot(q, wq_ref[...],
                 preferred_element_type=jnp.float32) + bq_ref[...]          # (TB, 2U) f32

    # --- fused K/V projection on flattened keys: one full-lane MXU matmul
    kv = jnp.dot(keys.reshape(TB * T, U), wkv_ref[...],
                 preferred_element_type=jnp.float32) + bkv_ref[...]         # (TB*T, 2U) f32
    kv = kv.reshape(TB, T, U2)                       # [..., :U]=Kp, [..., U:]=Vp

    # --- attention scores: degenerate M=1 matmul -> VPU mul + XLU lane-reduce
    #     (V half of qp is zero, so only Qp.Kp contributes)
    s = jnp.sum(qp[:, None, :] * kv, axis=-1)        # (TB, T)

    # --- softmax over T (f32 vector math; EUP exp, exact reciprocal for 1e-4 tol)
    m = jnp.max(s, axis=-1, keepdims=True)
    e = jnp.exp(s - m)
    p = e * pl.reciprocal(jnp.sum(e, axis=-1, keepdims=True), approx=False)  # (TB, T)

    # --- context: weighted sum over T -> VPU mul + sublane reduce.
    #     The K half of ctx2 is nulled by the zero rows of wfc.
    ctx2 = jnp.sum(p[:, :, None] * kv, axis=1)       # (TB, 2U)

    # --- fuse + relu: concat([ctx, q]) @ Wf == ctx @ Wf_ctx + q @ Wf_q
    out = (jnp.dot(ctx2, wfc_ref[...], preferred_element_type=jnp.float32)
           + jnp.dot(q, wfq_ref[...], preferred_element_type=jnp.float32)
           + bf_ref[...])
    o_ref[...] = jnp.maximum(out, 0.0).astype(o_ref.dtype)


# ---------------------------------------------------------------------------
# Host wrapper
# ---------------------------------------------------------------------------

def _vmem_capacity_bytes():
    try:
        return int(pltpu.get_tpu_info().vmem_capacity_bytes)
    except Exception:
        return 64 * 1024 * 1024   # conservative fallback: v7x per-TensorCore VMEM


def att_forward(query, keys, params, *, batch_tile=None, use_bf16=False):
    """query: (B, U), keys: (B, T, U).

    params = (wq, bq, wk, bk, wv, bv, wf, bf) with weights already transposed
    to (in_features, out_features) and biases shaped (1, out_features).
    Returns (B, U) f32.  `use_bf16=True` casts matmul operands to bfloat16
    (faster, but will not meet a 1e-4 check against an f32 reference).
    """
    B, U = query.shape
    _, T, _ = keys.shape
    wq, bq, wk, bk, wv, bv, wf, bf = params

    # --- host-side weight packing (traced XLA ops, negligible cost) ---
    scale = 1.0 / math.sqrt(float(U))
    zUU = jnp.zeros((U, U), jnp.float32)
    z1U = jnp.zeros((1, U), jnp.float32)
    wq_p = jnp.concatenate([wq * scale, zUU], axis=1)       # (U, 2U)
    bq_p = jnp.concatenate([bq * scale, z1U], axis=1)       # (1, 2U)
    wkv = jnp.concatenate([wk, wv], axis=1)                  # (U, 2U)
    bkv = jnp.concatenate([bk, bv], axis=1)                  # (1, 2U)
    wfc = jnp.concatenate([zUU, wf[:U, :]], axis=0)          # (2U, U): kills K half of ctx2
    wfq = wf[U:, :]                                          # (U, U)

    compute_dtype = jnp.bfloat16 if use_bf16 else jnp.float32
    dbytes = 2 if use_bf16 else 4

    # --- generation-aware VMEM budget (~3/4 of physical, capped at 96 MiB) ---
    vmem_cap = _vmem_capacity_bytes()
    vmem_limit = int(min(vmem_cap * 3 // 4, 96 * 1024 * 1024))

    # --- batch tile: amortize ~0.35us/step grid overhead with big tiles, keep the
    #     lane-padded, double-buffered keys tile inside ~half the VMEM budget, and
    #     keep >= 2 grid steps for big B so v7x's second TensorCore engages.
    lane = 128
    u_pad = ((U + lane - 1) // lane) * lane
    keys_row_bytes = T * u_pad * dbytes                       # per batch row, lane-padded
    tb_vmem = max(8, (vmem_limit // 2) // (2 * keys_row_bytes))

    if batch_tile is None:
        if B <= 16:
            TB = B                                            # tiny batch: single tile
        else:
            TB = min(1024, tb_vmem, pl.cdiv(B, 2))
    else:
        TB = int(batch_tile)

    if TB >= B:
        TB = B                                                # one full-extent block
        B_pad = B
    else:
        TB = max(8, (TB // 8) * 8)                            # (8,128) sublane constraint
        B_pad = pl.cdiv(B, TB) * TB

    q_in = query.astype(compute_dtype)
    k_in = keys.astype(compute_dtype)
    if B_pad != B:
        # zero-pad the ragged tail so softmax never runs over garbage rows
        q_in = jnp.pad(q_in, ((0, B_pad - B), (0, 0)))
        k_in = jnp.pad(k_in, ((0, B_pad - B), (0, 0), (0, 0)))

    wq_c = wq_p.astype(compute_dtype)
    wkv_c = wkv.astype(compute_dtype)
    wfq_c = wfq.astype(compute_dtype)
    # biases and wfc stay f32 (accumulation / f32 operands stay f32)

    grid = (B_pad // TB,)
    const = lambda i: (0, 0)                                  # weights stay VMEM-resident
    in_specs = [
        pl.BlockSpec((TB, U), lambda i: (i, 0)),              # query
        pl.BlockSpec((TB, T, U), lambda i: (i, 0, 0)),        # keys
        pl.BlockSpec((U, 2 * U), const),                      # wq (scaled, padded)
        pl.BlockSpec((1, 2 * U), const),                      # bq
        pl.BlockSpec((U, 2 * U), const),                      # wkv
        pl.BlockSpec((1, 2 * U), const),                      # bkv
        pl.BlockSpec((2 * U, U), const),                      # wf_ctx (padded)
        pl.BlockSpec((U, U), const),                          # wf_q
        pl.BlockSpec((1, U), const),                          # bf
    ]
    out_specs = pl.BlockSpec((TB, U), lambda i: (i, 0))

    out = pl.pallas_call(
        att_kernel,
        out_shape=jax.ShapeDtypeStruct((B_pad, U), jnp.float32),
        grid=grid,
        in_specs=in_specs,
        out_specs=out_specs,
        compiler_params=pltpu.CompilerParams(
            dimension_semantics=("parallel",),
            vmem_limit_bytes=vmem_limit,
        ),
    )(q_in, k_in, wq_c, bq_p, wkv_c, bkv, wfc, wfq_c, bf)

    return out[:B] if B_pad != B else out


# ---------------------------------------------------------------------------
# init helpers (torch conventions) + pure-JAX reference
# ---------------------------------------------------------------------------

def xavier_uniform(key, shape):
    # shape = (out_features, in_features), torch convention
    fan_out, fan_in = shape
    bound = math.sqrt(6.0 / (fan_in + fan_out))
    return jax.random.uniform(key, shape, jnp.float32, -bound, bound)


def linear_bias_init(key, out_features, in_features):
    # torch nn.Linear default bias init: U(-1/sqrt(fan_in), 1/sqrt(fan_in))
    bound = 1.0 / math.sqrt(in_features)
    return jax.random.uniform(key, (1, out_features), jnp.float32, -bound, bound)


def reference_forward(query, keys, params):
    wq, bq, wk, bk, wv, bv, wf, bf = params
    U = query.shape[-1]
    qp = query @ wq + bq
    kp = jnp.einsum('btu,uo->bto', keys, wk) + bk[None]
    vp = jnp.einsum('btu,uo->bto', keys, wv) + bv[None]
    s = jnp.einsum('bu,btu->bt', qp, kp) / math.sqrt(U)
    p = jax.nn.softmax(s, axis=-1)
    ctx = jnp.einsum('bt,btu->bu', p, vp)
    fused = jnp.concatenate([ctx, query], axis=-1)
    return jax.nn.relu(fused @ wf + bf)


if __name__ == "__main__":
    B, T, U = 8, 16, 64   # batch, num keys, units (module default units=64)

    key = jax.random.PRNGKey(0)
    (kq, kk, kv_, kf, kbq, kbk, kbv, kbf,
     kx1, kx2, kx3, kx4) = jax.random.split(key, 12)

    # torch Linear weights are (out, in); xavier_uniform on that shape, then
    # transpose to (in, out) for the kernel's x @ W convention.
    wq = xavier_uniform(kq, (U, U)).T
    wk = xavier_uniform(kk, (U, U)).T
    wv = xavier_uniform(kv_, (U, U)).T
    wf = xavier_uniform(kf, (U, 2 * U)).T       # (2U, U)

    bq = linear_bias_init(kbq, U, U)            # (1, U)
    bk = linear_bias_init(kbk, U, U)
    bv = linear_bias_init(kbv, U, U)
    bf = linear_bias_init(kbf, U, 2 * U)

    params = (wq, bq, wk, bk, wv, bv, wf, bf)

    query = jax.random.normal(kx1, (B, U), jnp.float32)
    keys = jax.random.normal(kx2, (B, T, U), jnp.float32)

    # f32 path, single tile
    out = jax.block_until_ready(att_forward(query, keys, params))
    ref = reference_forward(query, keys, params)
    assert out.shape == (B, U)
    assert jnp.allclose(out, ref, atol=1e-4, rtol=1e-4), "mismatch vs JAX reference (f32)"

    # multi-tile + ragged-batch path (B=20 padded to 24, TB=8 -> grid of 3)
    B2 = 20
    query2 = jax.random.normal(kx3, (B2, U), jnp.float32)
    keys2 = jax.random.normal(kx4, (B2, T, U), jnp.float32)
    out2 = jax.block_until_ready(att_forward(query2, keys2, params, batch_tile=8))
    ref2 = reference_forward(query2, keys2, params)
    assert out2.shape == (B2, U)
    assert jnp.allclose(out2, ref2, atol=1e-4, rtol=1e-4), "mismatch vs JAX reference (tiled)"

    # bf16 fast path: compiles/runs; loose tolerance (not expected to meet 1e-4)
    out_bf = jax.block_until_ready(att_forward(query, keys, params, use_bf16=True))
    assert out_bf.shape == (B, U)
    assert jnp.allclose(out_bf, ref, atol=0.15, rtol=0.15), "bf16 path diverged too far"

    # TODO(synk): norm=True branch (BatchNorm1d over query + attn) is not implemented;
    # this kernel reproduces the module's default norm=False path.
    print("KERNEL_OK")
</pallas_src>

<mosaic_0001>
module attributes {stable_mosaic.version = 11 : i64} {
  func.func @att_kernel(%arg0: i32, %arg1: memref<8x64xf32, #tpu.memory_space<vmem>>, %arg2: memref<8x16x64xf32, #tpu.memory_space<vmem>>, %arg3: memref<64x128xf32, #tpu.memory_space<vmem>>, %arg4: memref<1x128xf32, #tpu.memory_space<vmem>>, %arg5: memref<64x128xf32, #tpu.memory_space<vmem>>, %arg6: memref<1x128xf32, #tpu.memory_space<vmem>>, %arg7: memref<128x64xf32, #tpu.memory_space<vmem>>, %arg8: memref<64x64xf32, #tpu.memory_space<vmem>>, %arg9: memref<1x64xf32, #tpu.memory_space<vmem>>, %arg10: memref<8x64xf32, #tpu.memory_space<vmem>>) attributes {dimension_semantics = [#tpu.dimension_semantics<parallel>], iteration_bounds = array<i64: 1>, scalar_prefetch = 0 : i64, scratch_operands = 0 : i64, tpu.core_type = #tpu.core_type<tc>, window_params = [{transform_indices = @transform_0, window_bounds = array<i64: 8, 64>}, {transform_indices = @transform_1, window_bounds = array<i64: 8, 16, 64>}, {pipeline_mode = #tpu.pipeline_mode<synchronous>, transform_indices = @transform_2, window_bounds = array<i64: 64, 128>}, {pipeline_mode = #tpu.pipeline_mode<synchronous>, transform_indices = @transform_3, window_bounds = array<i64: 1, 128>}, {pipeline_mode = #tpu.pipeline_mode<synchronous>, transform_indices = @transform_4, window_bounds = array<i64: 64, 128>}, {pipeline_mode = #tpu.pipeline_mode<synchronous>, transform_indices = @transform_5, window_bounds = array<i64: 1, 128>}, {pipeline_mode = #tpu.pipeline_mode<synchronous>, transform_indices = @transform_6, window_bounds = array<i64: 128, 64>}, {pipeline_mode = #tpu.pipeline_mode<synchronous>, transform_indices = @transform_7, window_bounds = array<i64: 64, 64>}, {pipeline_mode = #tpu.pipeline_mode<synchronous>, transform_indices = @transform_8, window_bounds = array<i64: 1, 64>}, {transform_indices = @transform_9, window_bounds = array<i64: 8, 64>}]} {
    %c0 = arith.constant 0 : index
    %c0_0 = arith.constant 0 : index
    %0 = vector.load %arg1[%c0, %c0_0] : memref<8x64xf32, #tpu.memory_space<vmem>>, vector<8x64xf32>
    %c0_1 = arith.constant 0 : index
    %c0_2 = arith.constant 0 : index
    %c0_3 = arith.constant 0 : index
    %1 = vector.load %arg2[%c0_1, %c0_2, %c0_3] : memref<8x16x64xf32, #tpu.memory_space<vmem>>, vector<8x16x64xf32>
    %c0_4 = arith.constant 0 : index
    %c0_5 = arith.constant 0 : index
    %2 = vector.load %arg3[%c0_4, %c0_5] : memref<64x128xf32, #tpu.memory_space<vmem>>, vector<64x128xf32>
    %cst = arith.constant dense<0.000000e+00> : vector<8x128xf32>
    %3 = tpu.matmul %0, %2, %cst {dimension_numbers = #tpu.dot_dimension_numbers<[1], [0], [0], [1], [0, 0, 1, 1], [], []>} : vector<8x64xf32>, vector<64x128xf32>, vector<8x128xf32> -> vector<8x128xf32>
    %c0_6 = arith.constant 0 : index
    %c0_7 = arith.constant 0 : index
    %4 = vector.load %arg4[%c0_6, %c0_7] : memref<1x128xf32, #tpu.memory_space<vmem>>, vector<1x128xf32>
    %5 = vector.broadcast %4 : vector<1x128xf32> to vector<8x128xf32>
    %6 = arith.addf %3, %5 : vector<8x128xf32>
    %7 = vector.shape_cast %1 : vector<8x16x64xf32> to vector<128x64xf32>
    %c0_8 = arith.constant 0 : index
    %c0_9 = arith.constant 0 : index
    %8 = vector.load %arg5[%c0_8, %c0_9] : memref<64x128xf32, #tpu.memory_space<vmem>>, vector<64x128xf32>
    %cst_10 = arith.constant dense<0.000000e+00> : vector<128x128xf32>
    %9 = tpu.matmul %7, %8, %cst_10 {dimension_numbers = #tpu.dot_dimension_numbers<[1], [0], [0], [1], [0, 0, 1, 1], [], []>} : vector<128x64xf32>, vector<64x128xf32>, vector<128x128xf32> -> vector<128x128xf32>
    %c0_11 = arith.constant 0 : index
    %c0_12 = arith.constant 0 : index
    %10 = vector.load %arg6[%c0_11, %c0_12] : memref<1x128xf32, #tpu.memory_space<vmem>>, vector<1x128xf32>
    %11 = vector.broadcast %10 : vector<1x128xf32> to vector<128x128xf32>
    %12 = arith.addf %9, %11 : vector<128x128xf32>
    %13 = vector.shape_cast %12 : vector<128x128xf32> to vector<8x16x128xf32>
    %14 = vector.shape_cast %6 : vector<8x128xf32> to vector<8x1x128xf32>
    %15 = vector.broadcast %14 : vector<8x1x128xf32> to vector<8x16x128xf32>
    %16 = arith.mulf %15, %13 : vector<8x16x128xf32>
    %cst_13 = arith.constant dense<0.000000e+00> : vector<8x16xf32>
    %17 = vector.multi_reduction <add>, %16, %cst_13 [2] : vector<8x16x128xf32> to vector<8x16xf32>
    %cst_14 = arith.constant dense<0xFF800000> : vector<8xf32>
    %18 = vector.multi_reduction <maximumf>, %17, %cst_14 [1] : vector<8x16xf32> to vector<8xf32>
    %19 = vector.shape_cast %18 : vector<8xf32> to vector<8x1xf32>
    %20 = vector.broadcast %19 : vector<8x1xf32> to vector<8x16xf32>
    %21 = arith.subf %17, %20 : vector<8x16xf32>
    %22 = math.exp %21 : vector<8x16xf32>
    %cst_15 = arith.constant dense<0.000000e+00> : vector<8xf32>
    %23 = vector.multi_reduction <add>, %22, %cst_15 [1] : vector<8x16xf32> to vector<8xf32>
    %24 = vector.shape_cast %23 : vector<8xf32> to vector<8x1xf32>
    %25 = tpu.reciprocal %24 : vector<8x1xf32> -> vector<8x1xf32>
    %26 = vector.broadcast %25 : vector<8x1xf32> to vector<8x16xf32>
    %27 = arith.mulf %22, %26 : vector<8x16xf32>
    %28 = vector.shape_cast %27 : vector<8x16xf32> to vector<8x16x1xf32>
    %29 = vector.broadcast %28 : vector<8x16x1xf32> to vector<8x16x128xf32>
    %30 = arith.mulf %29, %13 : vector<8x16x128xf32>
    %cst_16 = arith.constant dense<0.000000e+00> : vector<8x128xf32>
    %31 = vector.multi_reduction <add>, %30, %cst_16 [1] : vector<8x16x128xf32> to vector<8x128xf32>
    %c0_17 = arith.constant 0 : index
    %c0_18 = arith.constant 0 : index
    %32 = vector.load %arg7[%c0_17, %c0_18] : memref<128x64xf32, #tpu.memory_space<vmem>>, vector<128x64xf32>
    %cst_19 = arith.constant dense<0.000000e+00> : vector<8x64xf32>
    %33 = tpu.matmul %31, %32, %cst_19 {dimension_numbers = #tpu.dot_dimension_numbers<[1], [0], [0], [1], [0, 0, 1, 1], [], []>} : vector<8x128xf32>, vector<128x64xf32>, vector<8x64xf32> -> vector<8x64xf32>
    %c0_20 = arith.constant 0 : index
    %c0_21 = arith.constant 0 : index
    %34 = vector.load %arg8[%c0_20, %c0_21] : memref<64x64xf32, #tpu.memory_space<vmem>>, vector<64x64xf32>
    %cst_22 = arith.constant dense<0.000000e+00> : vector<8x64xf32>
    %35 = tpu.matmul %0, %34, %cst_22 {dimension_numbers = #tpu.dot_dimension_numbers<[1], [0], [0], [1], [0, 0, 1, 1], [], []>} : vector<8x64xf32>, vector<64x64xf32>, vector<8x64xf32> -> vector<8x64xf32>
    %36 = arith.addf %33, %35 : vector<8x64xf32>
    %c0_23 = arith.constant 0 : index
    %c0_24 = arith.constant 0 : index
    %37 = vector.load %arg9[%c0_23, %c0_24] : memref<1x64xf32, #tpu.memory_space<vmem>>, vector<1x64xf32>
    %38 = vector.broadcast %37 : vector<1x64xf32> to vector<8x64xf32>
    %39 = arith.addf %36, %38 : vector<8x64xf32>
    %cst_25 = arith.constant 0.000000e+00 : f32
    %40 = vector.broadcast %cst_25 : f32 to vector<8x64xf32>
    %41 = arith.maximumf %39, %40 : vector<8x64xf32>
    %c0_26 = arith.constant 0 : index
    %c0_27 = arith.constant 0 : index
    %42 = vector.load %arg10[%c0_26, %c0_27] : memref<8x64xf32, #tpu.memory_space<vmem>>, vector<8x64xf32>
    tpu.vector_store %arg10[%c0_26, %c0_27], %41 {strides = array<i32>} : memref<8x64xf32, #tpu.memory_space<vmem>>, vector<8x64xf32>,
    return
  }
  func.func @transform_0(%arg0: i32) -> (i32, i32) {
    %c0_i32 = arith.constant 0 : i32
    %c0_i32_0 = arith.constant 0 : i32
    return %arg0, %c0_i32 : i32, i32
  }
  func.func @transform_1(%arg0: i32) -> (i32, i32, i32) {
    %c0_i32 = arith.constant 0 : i32
    %c0_i32_0 = arith.constant 0 : i32
    %c0_i32_1 = arith.constant 0 : i32
    return %arg0, %c0_i32, %c0_i32_0 : i32, i32, i32
  }
  func.func @transform_2(%arg0: i32) -> (i32, i32) {
    %c0_i32 = arith.constant 0 : i32
    %c0_i32_0 = arith.constant 0 : i32
    %c0_i32_1 = arith.constant 0 : i32
    return %c0_i32, %c0_i32_0 : i32, i32
  }
  func.func @transform_3(%arg0: i32) -> (i32, i32) {
    %c0_i32 = arith.constant 0 : i32
    %c0_i32_0 = arith.constant 0 : i32
    %c0_i32_1 = arith.constant 0 : i32
    return %c0_i32, %c0_i32_0 : i32, i32
  }
  func.func @transform_4(%arg0: i32) -> (i32, i32) {
    %c0_i32 = arith.constant 0 : i32
    %c0_i32_0 = arith.constant 0 : i32
    %c0_i32_1 = arith.constant 0 : i32
    return %c0_i32, %c0_i32_0 : i32, i32
  }
  func.func @transform_5(%arg0: i32) -> (i32, i32) {
    %c0_i32 = arith.constant 0 : i32
    %c0_i32_0 = arith.constant 0 : i32
    %c0_i32_1 = arith.constant 0 : i32
    return %c0_i32, %c0_i32_0 : i32, i32
  }
  func.func @transform_6(%arg0: i32) -> (i32, i32) {
    %c0_i32 = arith.constant 0 : i32
    %c0_i32_0 = arith.constant 0 : i32
    %c0_i32_1 = arith.constant 0 : i32
    return %c0_i32, %c0_i32_0 : i32, i32
  }
  func.func @transform_7(%arg0: i32) -> (i32, i32) {
    %c0_i32 = arith.constant 0 : i32
    %c0_i32_0 = arith.constant 0 : i32
    %c0_i32_1 = arith.constant 0 : i32
    return %c0_i32, %c0_i32_0 : i32, i32
  }
  func.func @transform_8(%arg0: i32) -> (i32, i32) {
    %c0_i32 = arith.constant 0 : i32
    %c0_i32_0 = arith.constant 0 : i32
    %c0_i32_1 = arith.constant 0 : i32
    return %c0_i32, %c0_i32_0 : i32, i32
  }
  func.func @transform_9(%arg0: i32) -> (i32, i32) {
    %c0_i32 = arith.constant 0 : i32
    %c0_i32_0 = arith.constant 0 : i32
    return %arg0, %c0_i32 : i32, i32
  }
}

</mosaic_0001>

<bundles_post_ra>
// kernel: tpu_custom_call.1
= control target key start
LH: loop header
LB: loop body
LE: loop exit
PB: predicated region body
PF: predicated region fallthrough
CT: control target
= control target key end

     0   :  { %14 = vsyncpa [#allocation3], 0  ;;  %s2322_s0 = inlined_call_operand.hbm [shape: f32[8,64], index: 0, kind: input, shape index: {}]   ;;  %s2323_s1 = inlined_call_operand.vmem [shape: f32[8,16,64], index: 1, kind: input, shape index: {}]   ;;  %s2324_s2 = inlined_call_operand.vmem [shape: f32[64,128], index: 2, kind: input, shape index: {}]   ;;  %s2325_s3 = inlined_call_operand.vmem [shape: f32[1,128], index: 3, kind: input, shape index: {}]   ;;  %s2326_s4 = inlined_call_operand.hbm [shape: f32[64,128], index: 4, kind: input, shape index: {}]   ;;  %s2327_s5 = inlined_call_operand.vmem [shape: f32[1,128], index: 5, kind: input, shape index: {}]   ;;  %s2328_s6 = inlined_call_operand.vmem [shape: f32[128,64], index: 6, kind: input, shape index: {}]   ;;  %s2329_s7 = inlined_call_operand.hbm [shape: f32[64,64], index: 7, kind: input, shape index: {}]   ;;  %s2330_s8 = inlined_call_operand.vmem [shape: f32[1,64], index: 8, kind: input, shape index: {}]   ;;  %s2331_s9 = inlined_call_operand.hbm [shape: f32[8,64], index: 9, kind: output, shape index: {}]  }
   0x1   :  { %15 = vsyncpa [#allocation6], 0 }
   0x2   :  { %16 = vsyncpa [#allocation4], 0  ;;  %s1685_s30 = smov [#allocation5]   ;;  %s1591_s13 = scalar_lea.hbm %s2326_s4, 1024 }
   0x3   :  { %s38_s10 = sshll.u32 %s1685_s30, 4  ;;  %p1592_p0 = scmp.ne.s32.totalorder %s2326_s4, %s1591_s13  ;;  %s39_s10 = int_to_ptr.vmem [resolvable:$true] %s38_s10 }
   0x4   :  { %p1595_p1 = scmp.lt.u32.totalorder %s1591_s13, %s2326_s4 }
   0x6   :  { %p1597_p2 = pnand %p1595_p1, %p1592_p0 }
   0x8   :  { %1600 = shalt.err (!%p1597_p2)
}
   0x9   :  { %s1601_s18 = scalar_lea.vmem %s39_s10, 1024  ;;  %p1606_p4 = scmp.lt.s32.totalorder %s39_s10, %s39_s10 }
   0xa   :  { %p1602_p3 = scmp.ne.s32.totalorder %s39_s10, %s1601_s18  ;;  %p1607_p5 = scmp.lt.s32.totalorder %s1601_s18, %s1601_s18 }
   0xc   :  { %p1608_p6 = por %p1607_p5, %p1606_p4 }
   0xe   :  { %p1609_p7 = pnand %p1608_p6, %p1602_p3 }
  0x10   :  { %1612 = shalt.err (!%p1609_p7)
}
  0x11   :  { %s1686_s19 = smov 128   ;;  %s1687_s20 = smov 8  }
  0x12   :  { %44 = dma.hbm_to_vmem [thread:$0]  %s2326_s4, 1024, %s39_s10, [#allocation6], %s1686_s19, %s1686_s19, %s1687_s20  }
  0x13   :  { %s1688_s23 = smov [#allocation2]   ;;  %s1689_s25 = smov [#allocation7]  }
  0x14   :  { %s23_s24 = sshll.u32 %s1688_s23, 4  ;;  %s54_s26 = sshll.u32 %s1689_s25, 4  ;;  %s24_s24 = int_to_ptr.vmem [resolvable:$true] %s23_s24  ;;  %s55_s26 = int_to_ptr.vmem [resolvable:$true] %s54_s26 }
  0x15   :  { %s1613_s29 = scalar_lea.hbm %s2322_s0, 128 }
  0x16   :  { %p1614_p8 = scmp.ne.s32.totalorder %s2322_s0, %s1613_s29  ;;  %p1617_p9 = scmp.lt.u32.totalorder %s1613_s29, %s2322_s0 }
  0x18   :  { %p1619_p10 = pnand %p1617_p9, %p1614_p8 }
  0x1a   :  { %1622 = shalt.err (!%p1619_p10)
}
  0x1b   :  { %s1623_s4 = scalar_lea.vmem %s24_s24, 128  ;;  %p1628_p12 = scmp.lt.s32.totalorder %s24_s24, %s24_s24 }
  0x1c   :  { %p1624_p11 = scmp.ne.s32.totalorder %s24_s24, %s1623_s4  ;;  %p1629_p13 = scmp.lt.s32.totalorder %s1623_s4, %s1623_s4 }
  0x1e   :  { %p1630_p0 = por %p1629_p13, %p1628_p12 }
  0x20   :  { %p1631_p1 = pnand %p1630_p0, %p1624_p11 }
  0x22   :  { %1634 = shalt.err (!%p1631_p1)
}
  0x23   :  { %26 = dma.hbm_to_vmem [thread:$0]  %s2322_s0, 128, %s24_s24, [#allocation3]  }
  0x24   :  { %s1635_s17 = scalar_lea.hbm %s2329_s7, 1024 }
  0x25   :  { %p1636_p2 = scmp.ne.s32.totalorder %s2329_s7, %s1635_s17  ;;  %p1639_p3 = scmp.lt.u32.totalorder %s1635_s17, %s2329_s7 }
  0x27   :  { %p1641_p4 = pnand %p1639_p3, %p1636_p2 }
  0x29   :  { %1644 = shalt.err (!%p1641_p4)
}
  0x2a   :  { %s1645_s25 = scalar_lea.vmem %s55_s26, 1024  ;;  %p1650_p6 = scmp.lt.s32.totalorder %s55_s26, %s55_s26 }
  0x2b   :  { %p1646_p5 = scmp.ne.s32.totalorder %s55_s26, %s1645_s25  ;;  %p1651_p7 = scmp.lt.s32.totalorder %s1645_s25, %s1645_s25 }
  0x2d   :  { %p1652_p8 = por %p1651_p7, %p1650_p6 }
  0x2f   :  { %p1653_p9 = pnand %p1652_p8, %p1646_p5 }
  0x31   :  { %1656 = shalt.err (!%p1653_p9)
}
  0x32   :  { %60 = dma.hbm_to_vmem [thread:$0]  %s2329_s7, 1024, %s55_s26, [#allocation6], %s1686_s19, %s1686_s19, %s1687_s20  }
  0x33   :  { %1679 = dma.done.wait [#allocation3], 128  }
  0x34   :  { %1680 = vsyncadd [#allocation3], 4294967168 }
  0x35   :  { %1681 = dma.done.wait [#allocation6], 2048  }
  0x36   :  { %1682 = vsyncadd [#allocation6], 4294965248  ;;  %v2332_v0 = vmov 0.0|0.0   ;;  %vm1691_vm0 = vmmov 0   ;;  %v1692_v1 = vmov 0.0   ;;  %v89_v2 = vld [vmem:[%s2324_s2] sm:$0xff]  ;;  %v391_v45 = vlaneseq }
  0x37   :  { %1480 = vmatprep.subr.bf16.mxu0 %v2332_v0  ;;  %1383 = vmatprep.mubr.msk.f32.mxu0 %vm1691_vm0, %v1692_v1  ;;  %v90_v3 = vld [vmem:[%s2324_s2 + $0x8] sm:$0xff]  ;;  %v179_v6 = vld [vmem:[#allocation5 + $0x8] sm:$0xff]  ;;  %v92_v8 = vld [vmem:[%s2324_s2 + $0x18] sm:$0xff]  ;;  %vm104_vm1 = vcmask 523264   ;;  %v1693_v43 = vmov 1966171168  }
  0x38   :  { %v178_v4 = vld [vmem:[#allocation5] sm:$0xff]  ;;  %v1481_v5 = vpack.c.bf16 %v90_v3, %v89_v2  ;;  %v91_v7 = vld [vmem:[%s2324_s2 + $0x10] sm:$0xff]  ;;  %v180_v10 = vld [vmem:[#allocation5 + $0x10] sm:$0xff]  ;;  %v389_v44 = vunpack.c.l.s4 %v1693_v43  ;;  %v1893_v47 = vshrl.u32 %v391_v45, 7  ;;  %vm551_vm2 = vcmask 130112   ;;  %s1695_s7 = smov [#allocation8]  }
  0x39   :  { %v1492_v9 = vpack.c.bf16 %v179_v6, %v178_v4  ;;  %v181_v11 = vld [vmem:[#allocation5 + $0x18] sm:$0xff]  ;;  %v1484_v12 = vpack.c.bf16 %v92_v8, %v91_v7  ;;  %v182_v14 = vld [vmem:[#allocation5 + $0x20] sm:$0xff]  ;;  %v183_v15 = vld [vmem:[#allocation5 + $0x28] sm:$0xff]  ;;  %vm616_vm3 = vcmask 1041409   ;;  %vm618_vm4 = vcmask 1042434   ;;  %s1277_s19 = sshll.u32 %s1695_s7, 4  ;;  %s1278_s19 = int_to_ptr.vmem [resolvable:$true] %s1277_s19 }
  0x3a   :  { %1482 = vmatpush3.bf16.msra.mxu0 %v1481_v5  ;;  %v1496_v13 = vpack.c.bf16 %v181_v11, %v180_v10  ;;  %v93_v16 = vld [vmem:[%s2324_s2 + $0x20] sm:$0xff]  ;;  %v94_v17 = vld [vmem:[%s2324_s2 + $0x28] sm:$0xff]  ;;  %v1500_v19 = vpack.c.bf16 %v183_v15, %v182_v14  ;;  %v184_v21 = vld [vmem:[#allocation5 + $0x30] sm:$0xff]  ;;  %v390_v46 = vunpack.c.0.s8 %v389_v44  ;;  %v1900_v56 = vsub.s32 0, %v1893_v47  ;;  %s1657_s20 = scalar_lea.vmem %s1278_s19, 128  ;;  %p1662_p11 = scmp.lt.s32.totalorder %s1278_s19, %s1278_s19 }
  0x3b   :  { %1493 = vmatprep.subr.bf16.mxu1 %v1492_v9  ;;  %1483 = vmatprep.subr.bf16.mxu0 %v2332_v0  ;;  %v73_v18 = vld [vmem:[%s2323_s1] sm:$0xff]  ;;  %v1487_v20 = vpack.c.bf16 %v94_v17, %v93_v16  ;;  %v95_v23 = vld [vmem:[%s2324_s2 + $0x30] sm:$0xff]  ;;  %v96_v24 = vld [vmem:[%s2324_s2 + $0x38] sm:$0xff]  ;;  %vm620_vm5 = vcmask 1043459   ;;  %vm622_vm6 = vcmask 1044484   ;;  %vm624_vm7 = vcmask 1045509   ;;  %p1658_p10 = scmp.ne.s32.totalorder %s1278_s19, %s1657_s20  ;;  %p1663_p12 = scmp.lt.s32.totalorder %s1657_s20, %s1657_s20 }
  0x3c   :  { %1495 = vmatpush3.bf16.msra.mxu1 %v1492_v9  ;;  %1402 = vmatprep.mubr.msk.f32.mxu1 %vm104_vm1, %v73_v18  ;;  %v185_v22 = vld [vmem:[#allocation5 + $0x38] sm:$0xff]  ;;  %v1490_v26 = vpack.c.bf16 %v96_v24, %v95_v23  ;;  %v74_v28 = vld [vmem:[%s2323_s1 + $0x8] sm:$0xff]  ;;  %v75_v29 = vld [vmem:[%s2323_s1 + $0x10] sm:$0xff]  ;;  %v393_v49 = vsub.s32 %v390_v46, %v1893_v47  ;;  %vm626_vm8 = vcmask 1046534   ;;  %vm628_vm9 = vcmask 1047559  }
  0x3d   :  { %1497 = vmatprep.subr.bf16.mxu1 %v1496_v13  ;;  %v1504_v25 = vpack.c.bf16 %v185_v22, %v184_v21  ;;  %v1822_v27 = vld [vmem:[#allocation2] sm:$0xff]  ;;  %v76_v30 = vld [vmem:[%s2323_s1 + $0x18] sm:$0xff]  ;;  %v78_v32 = vld [vmem:[%s2323_s1 + $0x28] sm:$0xff]  ;;  %vm631_vm10 = vcmask 130048   ;;  %p1664_p13 = por %p1663_p12, %p1662_p11 }
  0x3e   :  { %1485 = vmatpush3.bf16.msra.mxu0 %v1484_v12  ;;  %v77_v31 = vld [vmem:[%s2323_s1 + $0x20] sm:$0xff]  ;;  %v79_v33 = vld [vmem:[%s2323_s1 + $0x30] sm:$0xff]  ;;  %v80_v34 = vld [vmem:[%s2323_s1 + $0x38] sm:$0xff] }
  0x3f   :  { %1486 = vmatprep.subr.bf16.mxu0 %v2332_v0  ;;  %v81_v35 = vld [vmem:[%s2323_s1 + $0x40] sm:$0xff]  ;;  %v82_v36 = vld [vmem:[%s2323_s1 + $0x48] sm:$0xff]  ;;  %v83_v37 = vld [vmem:[%s2323_s1 + $0x50] sm:$0xff]  ;;  %p1665_p0 = pnand %p1664_p13, %p1658_p10 }
  0x40   :  { %1499 = vmatpush3.bf16.msra.mxu1 %v1496_v13  ;;  %v84_v38 = vld [vmem:[%s2323_s1 + $0x58] sm:$0xff]  ;;  %v85_v39 = vld [vmem:[%s2323_s1 + $0x60] sm:$0xff]  ;;  %v86_v40 = vld [vmem:[%s2323_s1 + $0x68] sm:$0xff] }
  0x41   :  { %1501 = vmatprep.subr.bf16.mxu1 %v1500_v19  ;;  %v87_v41 = vld [vmem:[%s2323_s1 + $0x70] sm:$0xff]  ;;  %v88_v42 = vld [vmem:[%s2323_s1 + $0x78] sm:$0xff]  ;;  %v1287_v48 = vld [vmem:[%s2325_s3] ss:$0 sm:$0xff] }
  0x42   :  { %1488 = vmatpush3.bf16.msra.mxu0 %v1487_v20  ;;  %v1905_v57 = vld [vmem:[%s2327_s5] ss:$0 sm:$0xff] }
  0x43   :  { %1489 = vmatprep.subr.bf16.mxu0 %v2332_v0 }
  0x44   :  { %1503 = vmatpush3.bf16.msra.mxu1 %v1500_v19 }
  0x45   :  { %1505 = vmatprep.subr.bf16.mxu1 %v1504_v25 }
  0x46   :  { %1491 = vmatpush3.bf16.msra.mxu0 %v1490_v26 }
  0x47   :  { %1508 = vmatprep.subr.bf16.mxu0 %v2332_v0 }
  0x48   :  { %1507 = vmatpush3.bf16.msra.mxu1 %v1504_v25 }
  0x49   :  { %1384 = vmatmul.mubr.msk.f32.vlgmr.msra.gmra.mrb[0].mxu0 %vm104_vm1, %v1822_v27  ;;  %1520 = vmatprep.subr.bf16.mxu1 %v2332_v0 }
  0x4a   :  { %1442 = vmatprep.mubr.msk.f32.mxu0 %vm1691_vm0, %v1692_v1 }
  0x4b   :  { %1403 = vmatmul.mubr.msk.f32.vlgmr.msra.gmra.mrb[0].mxu1 %vm104_vm1, %v74_v28 }
  0x4c   :  { %1405 = vmatprep.mubr.msk.f32.mxu1 %vm104_vm1, %v75_v29 }
  0x4f   :  { %1406 = vmatmul.mubr.msk.f32.gmra.mrb[2].mxu1 %vm104_vm1, %v76_v30 }
  0x50   :  { %1408 = vmatprep.mubr.msk.f32.mxu1 %vm104_vm1, %v77_v31 }
  0x53   :  { %1409 = vmatmul.mubr.msk.f32.gmra.mrb[4].mxu1 %vm104_vm1, %v78_v32 }
  0x54   :  { %1411 = vmatprep.mubr.msk.f32.mxu1 %vm104_vm1, %v79_v33 }
  0x57   :  { %1412 = vmatmul.mubr.msk.f32.gmra.mrb[6].mxu1 %vm104_vm1, %v80_v34 }
  0x58   :  { %1414 = vmatprep.mubr.msk.f32.mxu1 %vm104_vm1, %v81_v35 }
  0x5b   :  { %1415 = vmatmul.mubr.msk.f32.gmra.mrb[8].mxu1 %vm104_vm1, %v82_v36 }
  0x5c   :  { %1417 = vmatprep.mubr.msk.f32.mxu1 %vm104_vm1, %v83_v37 }
  0x5f   :  { %1418 = vmatmul.mubr.msk.f32.gmra.mrb[10].mxu1 %vm104_vm1, %v84_v38 }
  0x60   :  { %1420 = vmatprep.mubr.msk.f32.mxu1 %vm104_vm1, %v85_v39 }
  0x63   :  { %1421 = vmatmul.mubr.msk.f32.gmra.mrb[12].mxu1 %vm104_vm1, %v86_v40 }
  0x64   :  { %1423 = vmatprep.mubr.msk.f32.mxu1 %vm104_vm1, %v87_v41 }
  0x67   :  { %1424 = vmatmul.mubr.msk.f32.gmra.mrb[14].mxu1 %vm104_vm1, %v88_v42 }
  0x68   :  { %1477 = vmatprep.mubr.msk.f32.mxu1 %vm1691_vm0, %v1692_v1 }
 0x11c   :  { %v174_v50 = vpop.f32.mrb[0].mxu0 }
 0x11d   :  { %v175_v51 = vadd.f32 %v1287_v48, %v174_v50  ;;  %v1385_v52 = vpop.f32.mrb[1].mxu0 }
 0x11e   :  { %v1404_v53 = vpop.f32.mrb[0].mxu1 }
 0x11f   :  { %v394_v54 = vrot.slane %v175_v51, %v393_v49  ;;  %v307_v55 = vpop.f32.mrb[1].mxu1  ;;  %v387_v5 = vcombine.high %v175_v51, %v175_v51  ;;  %v1917_v7 = vadd.f32 %v1404_v53, %v1905_v57 }
 0x120   :  { %v1908_v61 = vadd.f32 %v1905_v57, %v307_v55 }
 0x121   :  { %v402_v58 = vcombine.high %v394_v54, %v394_v54  ;;  %v410_v59 = vrot.slane %v394_v54, %v393_v49  ;;  %v401_v14 = vrot.slane %v387_v5, %v393_v49 }
 0x122   :  { %v1407_v60 = vpop.f32.mrb[2].mxu1 }
 0x123   :  { %v317_v62 = vpop.f32.mrb[3].mxu1  ;;  %v439_v63 = vrot.slane %v410_v59, %v1900_v56  ;;  %v424_v1 = vrot.slane %v402_v58, %v393_v49  ;;  %v1920_v8 = vadd.f32 %v1407_v60, %v1905_v57  ;;  %v432_v11 = vcombine.high %v410_v59, %v410_v59 }
 0x124   :  { %v1912_v2 = vadd.f32 %v1905_v57, %v317_v62  ;;  %v403_v23 = vcombine.high %v401_v14, %v401_v14  ;;  %v417_v30 = vrot.slane %v401_v14, %v393_v49  ;;  %v541_v14 = vand.u32 127, %v391_v45 }
 0x125   :  { %v476_v3 = vmul.f32 %v439_v63, %v1908_v61  ;;  %v443_v4 = vrot.slane %v424_v1, %v1900_v56  ;;  %v477_v13 = vmul.f32 %v439_v63, %v1917_v7  ;;  %v447_v19 = vrot.slane %v432_v11, %v1900_v56 }
 0x126   :  { %v1410_v6 = vpop.f32.mrb[4].mxu1  ;;  %v434_v20 = vcombine.high %v424_v1, %v424_v1  ;;  %v455_v37 = vrot.slane %v417_v30, %v1900_v56  ;;  %v431_v38 = vrot.slane %v403_v23, %v393_v49  ;;  %v433_v48 = vcombine.high %v417_v30, %v417_v30 }
 0x127   :  { %v327_v9 = vpop.f32.mrb[5].mxu1  ;;  %492 = vadd.xlane.f32.xlu0 %v476_v3  ;;  %v478_v10 = vmul.f32 %v443_v4, %v1912_v2  ;;  %v1928_v16 = vadd.f32 %v1410_v6, %v1905_v57  ;;  %v479_v18 = vmul.f32 %v443_v4, %v1920_v8  ;;  %v2006_v23 = vsub.s32 %v541_v14, %v1893_v47 }
 0x128   :  { %v1924_v12 = vadd.f32 %v1905_v57, %v327_v9  ;;  %v451_v29 = vrot.slane %v434_v20, %v1900_v56  ;;  %v459_v46 = vrot.slane %v431_v38, %v1900_v56  ;;  %v463_v55 = vrot.slane %v433_v48, %v1900_v56 }
 0x129   :  { %496 = vadd.xlane.f32.xlu1 %v478_v10  ;;  %v481_v28 = vmul.f32 %v447_v19, %v1928_v16  ;;  %v435_v58 = vcombine.high %v431_v38, %v431_v38 }
 0x12a   :  { %v1413_v15 = vpop.f32.mrb[6].mxu1  ;;  %v480_v22 = vmul.f32 %v447_v19, %v1924_v12 }
 0x12b   :  { %v337_v17 = vpop.f32.mrb[7].mxu1  ;;  %494 = vadd.xlane.f32.xlu0 %v477_v13  ;;  %v1937_v25 = vadd.f32 %v1413_v15, %v1905_v57  ;;  %v467_v1 = vrot.slane %v435_v58, %v1900_v56 }
 0x12c   :  { %v1933_v21 = vadd.f32 %v1905_v57, %v337_v17  ;;  %v546_v17 = vadd.s32 4294967288, %v541_v14 }
 0x12d   :  { %498 = vadd.xlane.f32.xlu1 %v479_v18  ;;  %v483_v36 = vmul.f32 %v451_v29, %v1937_v25 }
 0x12e   :  { %v1416_v24 = vpop.f32.mrb[8].mxu1  ;;  %v482_v32 = vmul.f32 %v451_v29, %v1933_v21  ;;  %v2001_v20 = vsub.s32 %v546_v17, %v1893_v47 }
 0x12f   :  { %v347_v26 = vpop.f32.mrb[9].mxu1  ;;  %500 = vadd.xlane.f32.xlu0 %v480_v22  ;;  %v1946_v34 = vadd.f32 %v1416_v24, %v1905_v57 }
 0x130   :  { %v1942_v31 = vadd.f32 %v1905_v57, %v347_v26 }
 0x131   :  { %502 = vadd.xlane.f32.xlu1 %v481_v28  ;;  %v485_v44 = vmul.f32 %v455_v37, %v1946_v34 }
 0x132   :  { %v1419_v33 = vpop.f32.mrb[10].mxu1  ;;  %v484_v40 = vmul.f32 %v455_v37, %v1942_v31 }
 0x133   :  { %v357_v35 = vpop.f32.mrb[11].mxu1  ;;  %504 = vadd.xlane.f32.xlu0 %v482_v32  ;;  %v1955_v42 = vadd.f32 %v1419_v33, %v1905_v57 }
 0x134   :  { %v1951_v39 = vadd.f32 %v1905_v57, %v357_v35 }
 0x135   :  { %506 = vadd.xlane.f32.xlu1 %v483_v36  ;;  %v487_v54 = vmul.f32 %v459_v46, %v1955_v42 }
 0x136   :  { %v1422_v41 = vpop.f32.mrb[12].mxu1  ;;  %v486_v49 = vmul.f32 %v459_v46, %v1951_v39 }
 0x137   :  { %v367_v43 = vpop.f32.mrb[13].mxu1  ;;  %508 = vadd.xlane.f32.xlu0 %v484_v40  ;;  %v1964_v52 = vadd.f32 %v1422_v41, %v1905_v57 }
 0x138   :  { %v1960_v50 = vadd.f32 %v1905_v57, %v367_v43 }
 0x139   :  { %510 = vadd.xlane.f32.xlu1 %v485_v44  ;;  %v489_v63 = vmul.f32 %v463_v55, %v1964_v52 }
 0x13a   :  { %v1425_v51 = vpop.f32.mrb[14].mxu1  ;;  %v488_v60 = vmul.f32 %v463_v55, %v1960_v50 }
 0x13b   :  { %v377_v53 = vpop.f32.mrb[15].mxu1  ;;  %512 = vadd.xlane.f32.xlu0 %v486_v49  ;;  %v1973_v62 = vadd.f32 %v1425_v51, %v1905_v57 }
 0x13c   :  { %v1969_v59 = vadd.f32 %v1905_v57, %v377_v53 }
 0x13d   :  { %514 = vadd.xlane.f32.xlu1 %v487_v54  ;;  %v491_v4 = vmul.f32 %v467_v1, %v1973_v62 }
 0x13e   :  { %v490_v3 = vmul.f32 %v467_v1, %v1969_v59 }
 0x13f   :  { %516 = vadd.xlane.f32.xlu0 %v488_v60 }
 0x141   :  { %518 = vadd.xlane.f32.xlu1 %v489_v63 }
 0x143   :  { %520 = vadd.xlane.f32.xlu0 %v490_v3 }
 0x145   :  { %522 = vadd.xlane.f32.xlu1 %v491_v4 }
 0x1b4   :  { %v1979_v5 = vpop.xlane.xlu0 %492 }
 0x1b5   :  { %v545_v36 = vrot.slane %v1979_v5, %v2006_v23 }
 0x1b6   :  { %v1981_v6 = vpop.xlane.xlu1 %496 }
 0x1b7   :  { %v556_v28 = vrot.slane %v1981_v6, %v2006_v23 }
 0x1b8   :  { %v1983_v9 = vpop.xlane.xlu0 %494 }
 0x1b9   :  { %v550_v29 = vrot.slane %v1983_v9, %v2001_v20 }
 0x1ba   :  { %v1985_v57 = vpop.xlane.xlu1 %498 }
 0x1bb   :  { %v560_v24 = vrot.slane %v1985_v57, %v2001_v20  ;;  %v552_v46 = vsel %vm551_vm2, %v550_v29, %v545_v36  ;;  %v642_v36 = vsub.s32 1, %v1893_v47 }
 0x1bc   :  { %v1987_v10 = vpop.xlane.xlu0 %500 }
 0x1bd   :  { %v565_v32 = vrot.slane %v1987_v10, %v2006_v23  ;;  %v561_v37 = vsel %vm551_vm2, %v560_v24, %v556_v28 }
 0x1be   :  { %v1989_v11 = vpop.xlane.xlu1 %502  ;;  %v617_v53 = vsel %vm616_vm3, %v561_v37, %v552_v46 }
 0x1bf   :  { %v569_v45 = vrot.slane %v1989_v11, %v2001_v20 }
 0x1c0   :  { %v1991_v13 = vpop.xlane.xlu0 %504 }
 0x1c1   :  { %v574_v38 = vrot.slane %v1991_v13, %v2006_v23  ;;  %v570_v41 = vsel %vm551_vm2, %v569_v45, %v565_v32 }
 0x1c2   :  { %v1994_v15 = vpop.xlane.xlu1 %506  ;;  %v619_v60 = vsel %vm618_vm4, %v570_v41, %v617_v53  ;;  %v2335_v41 = vsub.s32 5, %v1893_v47 }
 0x1c3   :  { %v578_v30 = vrot.slane %v1994_v15, %v2001_v20 }
 0x1c4   :  { %v1996_v18 = vpop.xlane.xlu0 %508 }
 0x1c5   :  { %v583_v43 = vrot.slane %v1996_v18, %v2006_v23  ;;  %v579_v48 = vsel %vm551_vm2, %v578_v30, %v574_v38 }
 0x1c6   :  { %v1998_v19 = vpop.xlane.xlu1 %510  ;;  %v621_v1 = vsel %vm620_vm5, %v579_v48, %v619_v60  ;;  %v2337_v48 = vsub.s32 2, %v1893_v47 }
 0x1c7   :  { %v587_v33 = vrot.slane %v1998_v19, %v2001_v20 }
 0x1c8   :  { %v2003_v22 = vpop.xlane.xlu0 %512 }
 0x1c9   :  { %v592_v49 = vrot.slane %v2003_v22, %v2006_v23  ;;  %v588_v54 = vsel %vm551_vm2, %v587_v33, %v583_v43  ;;  %v1694_v33 = vmov 0  }
 0x1ca   :  { %v2012_v26 = vpop.xlane.xlu1 %514  ;;  %v623_v24 = vsel %vm622_vm6, %v588_v54, %v621_v1  ;;  %1556 = vset.pattern.permute.xlu0 %v1694_v33  ;;  %1555 = vset.pattern.permute.xlu1 %v1694_v33 }
 0x1cb   :  { %v596_v40 = vrot.slane %v2012_v26, %v2001_v20 }
 0x1cc   :  { %v2024_v35 = vpop.xlane.xlu0 %516 }
 0x1cd   :  { %v601_v55 = vrot.slane %v2024_v35, %v2006_v23  ;;  %v597_v63 = vsel %vm551_vm2, %v596_v40, %v592_v49 }
 0x1ce   :  { %v2036_v44 = vpop.xlane.xlu1 %518  ;;  %v625_v45 = vsel %vm624_vm7, %v597_v63, %v623_v24 }
 0x1cf   :  { %v605_v51 = vrot.slane %v2036_v44, %v2001_v20 }
 0x1d0   :  { %v2048_v58 = vpop.xlane.xlu0 %520 }
 0x1d1   :  { %v606_v4 = vsel %vm551_vm2, %v605_v51, %v601_v55  ;;  %v610_v14 = vrot.slane %v2048_v58, %v2006_v23  ;;  %v2334_v51 = vsub.s32 6, %v1893_v47 }
 0x1d2   :  { %v2053_v3 = vpop.xlane.xlu1 %522  ;;  %v627_v29 = vsel %vm626_vm8, %v606_v4, %v625_v45  ;;  %v2336_v4 = vsub.s32 3, %v1893_v47 }
 0x1d3   :  { %v614_v17 = vrot.slane %v2053_v3, %v2001_v20 }
 0x1d5   :  { %v615_v28 = vsel %vm551_vm2, %v614_v17, %v610_v14 }
 0x1d6   :  { %v629_v30 = vsel %vm628_vm9, %v615_v28, %v627_v29 }
 0x1d7   :  { %v632_v32 = vsel %vm631_vm10, %v629_v30, -inf }
 0x1d8   :  { %633 = vmax.xlane.f32.xlu0 %v632_v32 }
 0x265   :  { %v634_v37 = vpop.xlane.xlu0 %633 }
 0x266   :  { %v639_v38 = vrot.slane %v634_v37, %v1900_v56  ;;  %v643_v40 = vrot.slane %v634_v37, %v642_v36  ;;  %v2078_v53 = vrot.slane %v634_v37, %v2335_v41  ;;  %v647_v60 = vrot.slane %v634_v37, %v2337_v48 }
 0x267   :  { %v651_v28 = vrot.slane %v634_v37, %v2336_v4 }
 0x268   :  { %v676_v43 = vsub.f32 %v1979_v5, %v639_v38  ;;  %v677_v46 = vsub.f32 %v1983_v9, %v639_v38  ;;  %v678_v49 = vsub.f32 %v1981_v6, %v643_v40  ;;  %v679_v63 = vsub.f32 %v1985_v57, %v643_v40 }
 0x269   :  { %v666_v9 = vsub.s32 7, %v1893_v47  ;;  %v2086_v6 = vrot.slane %v634_v37, %v2334_v51  ;;  %v686_v1 = vsub.f32 %v2003_v22, %v2078_v53  ;;  %v680_v14 = vsub.f32 %v1987_v10, %v647_v60 }
 0x26a   :  { %v692_v54 = vmul.f32 1.442695, %v676_v43  ;;  %v694_v55 = vmul.f32 1.442695, %v677_v46  ;;  %v696_v5 = vmul.f32 1.442695, %v678_v49  ;;  %v681_v29 = vsub.f32 %v1989_v11, %v647_v60 }
 0x26b   :  { %v698_v17 = vmul.f32 1.442695, %v679_v63  ;;  %v667_v57 = vrot.slane %v634_v37, %v666_v9  ;;  %v688_v24 = vsub.f32 %v2024_v35, %v2086_v6  ;;  %v712_v45 = vmul.f32 1.442695, %v686_v1 }
 0x26c   :  { %1557 = vpow2.f32 %v692_v54  ;;  %v700_v22 = vmul.f32 1.442695, %v680_v14  ;;  %v654_v35 = vsub.s32 4, %v1893_v47  ;;  %v682_v38 = vsub.f32 %v1991_v13, %v651_v28 }
 0x26d   :  { %1559 = vpow2.f32 %v694_v55  ;;  %v690_v10 = vsub.f32 %v2048_v58, %v667_v57  ;;  %v716_v32 = vmul.f32 1.442695, %v688_v24  ;;  %v702_v40 = vmul.f32 1.442695, %v681_v29 }
 0x26e   :  { %1561 = vpow2.f32 %v696_v5  ;;  %v655_v58 = vrot.slane %v634_v37, %v654_v35  ;;  %v683_v46 = vsub.f32 %v1994_v15, %v651_v28  ;;  %v704_v49 = vmul.f32 1.442695, %v682_v38 }
 0x26f   :  { %1563 = vpow2.f32 %v698_v17  ;;  %v720_v43 = vmul.f32 1.442695, %v690_v10  ;;  %v687_v14 = vsub.f32 %v2012_v26, %v2078_v53  ;;  %v691_v29 = vsub.f32 %v2053_v3, %v667_v57 }
 0x270   :  { %1565 = vpow2.f32 %v712_v45  ;;  %v684_v55 = vsub.f32 %v1996_v18, %v655_v58  ;;  %v706_v60 = vmul.f32 1.442695, %v683_v46  ;;  %v685_v37 = vsub.f32 %v1998_v19, %v655_v58 }
 0x271   :  { %1567 = vpow2.f32 %v700_v22  ;;  %v689_v19 = vsub.f32 %v2036_v44, %v2086_v6  ;;  %v714_v45 = vmul.f32 1.442695, %v687_v14  ;;  %v722_v22 = vmul.f32 1.442695, %v691_v29 }
 0x272   :  { %1569 = vpow2.f32 %v716_v32  ;;  %v708_v5 = vmul.f32 1.442695, %v684_v55  ;;  %v710_v17 = vmul.f32 1.442695, %v685_v37 }
 0x273   :  { %1571 = vpow2.f32 %v702_v40  ;;  %v718_v26 = vmul.f32 1.442695, %v689_v19 }
 0x274   :  { %1573 = vpow2.f32 %v720_v43 }
 0x275   :  { %1575 = vpow2.f32 %v704_v49 }
 0x276   :  { %v2099_v30 = vpop.eup %1557  ;;  %1577 = vpow2.f32 %v706_v60 }
 0x277   :  { %v2102_v33 = vpop.eup %1559  ;;  %741 = vperm.xlu1 %1555, %v2099_v30   ;;  %1579 = vpow2.f32 %v708_v5 }
 0x278   :  { %744 = vperm.xlu0 %1556, %v2102_v33   ;;  %v2108_v11 = vpop.eup %1561  ;;  %1581 = vpow2.f32 %v710_v17 }
 0x279   :  { %v2114_v54 = vpop.eup %1563  ;;  %1583 = vpow2.f32 %v714_v45 }
 0x27a   :  { %v2117_v13 = vpop.eup %1565  ;;  %1585 = vpow2.f32 %v718_v26 }
 0x27b   :  { %747 = vperm.xlu1 %1555, %v2108_v11   ;;  %v2121_v63 = vpop.eup %1567  ;;  %1587 = vpow2.f32 %v722_v22 }
 0x27c   :  { %771 = vperm.xlu0 %1556, %v2117_v13   ;;  %v2124_v15 = vpop.eup %1569 }
 0x27d   :  { %v2128_v1 = vpop.eup %1571 }
 0x27e   :  { %v2131_v18 = vpop.eup %1573 }
 0x27f   :  { %750 = vperm.xlu1 %1555, %v2114_v54   ;;  %v2136_v24 = vpop.eup %1575 }
 0x280   :  { %777 = vperm.xlu0 %1556, %v2124_v15   ;;  %v2141_v28 = vpop.eup %1577 }
 0x281   :  { %v2145_v53 = vpop.eup %1579 }
 0x282   :  { %v2148_v10 = vpop.eup %1581 }
 0x283   :  { %753 = vperm.xlu1 %1555, %v2121_v63   ;;  %v2151_v44 = vpop.eup %1583 }
 0x284   :  { %783 = vperm.xlu0 %1556, %v2131_v18   ;;  %v2154_v6 = vpop.eup %1585 }
 0x285   :  { %v2157_v3 = vpop.eup %1587 }
 0x287   :  { %756 = vperm.xlu1 %1555, %v2128_v1  }
 0x28b   :  { %759 = vperm.xlu1 %1555, %v2136_v24  }
 0x28f   :  { %762 = vperm.xlu1 %1555, %v2141_v28  }
 0x293   :  { %765 = vperm.xlu1 %1555, %v2145_v53  }
 0x297   :  { %768 = vperm.xlu1 %1555, %v2148_v10  }
 0x29b   :  { %774 = vperm.xlu1 %1555, %v2151_v44  }
 0x29f   :  { %780 = vperm.xlu1 %1555, %v2154_v6  }
 0x2a3   :  { %786 = vperm.xlu1 %1555, %v2157_v3  }
 0x2f6   :  { %v742_v57 = vpop.permute.xlu1 %741 }
 0x2f7   :  { %v745_v46 = vpop.permute.xlu0 %744  ;;  %v791_v29 = vrot.slane %v742_v57, %v2006_v23 }
 0x2f8   :  { %v795_v45 = vrot.slane %v745_v46, %v2001_v20 }
 0x2fa   :  { %v748_v32 = vpop.permute.xlu1 %747  ;;  %v796_v57 = vsel %vm551_vm2, %v795_v45, %v791_v29 }
 0x2fb   :  { %v772_v60 = vpop.permute.xlu0 %771  ;;  %v800_v26 = vrot.slane %v748_v32, %v2006_v23 }
 0x2fc   :  { %v836_v32 = vrot.slane %v772_v60, %v2006_v23 }
 0x2fe   :  { %v751_v38 = vpop.permute.xlu1 %750 }
 0x2ff   :  { %v804_v5 = vrot.slane %v751_v38, %v2001_v20  ;;  %v778_v14 = vpop.permute.xlu0 %777 }
 0x301   :  { %v805_v41 = vsel %vm551_vm2, %v804_v5, %v800_v26 }
 0x302   :  { %v754_v40 = vpop.permute.xlu1 %753  ;;  %v860_v5 = vsel %vm616_vm3, %v805_v41, %v796_v57 }
 0x303   :  { %v809_v0 = vrot.slane %v754_v40, %v2006_v23 }
 0x306   :  { %v757_v43 = vpop.permute.xlu1 %756 }
 0x307   :  { %v813_v17 = vrot.slane %v757_v43, %v2001_v20 }
 0x309   :  { %v814_v43 = vsel %vm551_vm2, %v813_v17, %v809_v0 }
 0x30a   :  { %v760_v58 = vpop.permute.xlu1 %759  ;;  %v861_v0 = vsel %vm618_vm4, %v814_v43, %v860_v5 }
 0x30b   :  { %v818_v38 = vrot.slane %v760_v58, %v2006_v23  ;;  %v784_v58 = vpop.permute.xlu0 %783 }
 0x30c   :  { %v854_v29 = vrot.slane %v784_v58, %v2006_v23  ;;  %v2340_v58 = vsub.s32 5, %v1893_v47 }
 0x30e   :  { %v763_v49 = vpop.permute.xlu1 %762 }
 0x30f   :  { %v822_v22 = vrot.slane %v763_v49, %v2001_v20 }
 0x311   :  { %v823_v49 = vsel %vm551_vm2, %v822_v22, %v818_v38 }
 0x312   :  { %v766_v55 = vpop.permute.xlu1 %765  ;;  %v862_v17 = vsel %vm620_vm5, %v823_v49, %v861_v0  ;;  %v2341_v0 = vsub.s32 6, %v1893_v47 }
 0x313   :  { %v827_v46 = vrot.slane %v766_v55, %v2006_v23 }
 0x316   :  { %v769_v37 = vpop.permute.xlu1 %768 }
 0x317   :  { %v831_v51 = vrot.slane %v769_v37, %v2001_v20  ;;  %v845_v37 = vrot.slane %v778_v14, %v2006_v23 }
 0x31a   :  { %v775_v19 = vpop.permute.xlu1 %774 }
 0x31b   :  { %v840_v4 = vrot.slane %v775_v19, %v2001_v20  ;;  %v832_v19 = vsel %vm551_vm2, %v831_v51, %v827_v46 }
 0x31d   :  { %v841_v55 = vsel %vm551_vm2, %v840_v4, %v836_v32 }
 0x31e   :  { %v781_v48 = vpop.permute.xlu1 %780 }
 0x31f   :  { %v849_v40 = vrot.slane %v781_v48, %v2001_v20  ;;  %v863_v48 = vsel %vm622_vm6, %v832_v19, %v862_v17 }
 0x320   :  { %v864_v41 = vsel %vm624_vm7, %v841_v55, %v863_v48  ;;  %v1087_v48 = vld [vmem:[%s2328_s6 + $0x30] sm:$0xff] }
 0x321   :  { %v850_v45 = vsel %vm551_vm2, %v849_v40, %v845_v37 }
 0x322   :  { %v787_v60 = vpop.permute.xlu1 %786  ;;  %v865_v51 = vsel %vm626_vm8, %v850_v45, %v864_v41  ;;  %v1085_v45 = vld [vmem:[%s2328_s6 + $0x20] sm:$0xff] }
 0x323   :  { %v858_v14 = vrot.slane %v787_v60, %v2001_v20 }
 0x325   :  { %v859_v26 = vsel %vm551_vm2, %v858_v14, %v854_v29  ;;  %v1088_v14 = vld [vmem:[%s2328_s6 + $0x38] sm:$0xff] }
 0x326   :  { %v866_v22 = vsel %vm628_vm9, %v859_v26, %v865_v51  ;;  %v1530_v41 = vpack.c.bf16 %v1088_v14, %v1087_v48  ;;  %v1097_v26 = vld [vmem:[#allocation7] sm:$0xff]  ;;  %v1098_v51 = vld [vmem:[#allocation7 + $0x8] sm:$0xff] }
 0x327   :  { %v868_v4 = vsel %vm631_vm10, %v866_v22, 0.0  ;;  %v1509_v22 = vpack.c.bf16 %v1098_v51, %v1097_v26 }
 0x328   :  { %869 = vadd.xlane.f32.xlu0 %v868_v4  ;;  %v1089_v4 = vld [vmem:[%s2328_s6 + $0x40] sm:$0xff] }
 0x329   :  { %1510 = vmatpush3.bf16.msra.mxu0 %v1509_v22 }
 0x3b5   :  { %v870_v38 = vpop.xlane.xlu0 %869 }
 0x3b6   :  { %1589 = vrcp.f32 %v870_v38  ;;  %v1090_v38 = vld [vmem:[%s2328_s6 + $0x48] sm:$0xff] }
 0x3c0   :  { %v1590_v43 = vpop.eup %1589 }
 0x3c1   :  { %v892_v23 = vrot.slane %v1590_v43, %v654_v35  ;;  %v876_v46 = vrot.slane %v1590_v43, %v1900_v56  ;;  %v904_v32 = vrot.slane %v1590_v43, %v666_v9  ;;  %v880_v37 = vrot.slane %v1590_v43, %v642_v36 }
 0x3c2   :  { %v896_v19 = vrot.slane %v1590_v43, %v2340_v58  ;;  %v900_v55 = vrot.slane %v1590_v43, %v2341_v0 }
 0x3c3   :  { %v921_v20 = vmul.f32 %v2145_v53, %v892_v23  ;;  %v913_v57 = vmul.f32 %v2099_v30, %v876_v46  ;;  %v927_v49 = vmul.f32 %v2131_v18, %v904_v32  ;;  %v914_v40 = vmul.f32 %v2102_v33, %v876_v46  ;;  %v1100_v46 = vld [vmem:[#allocation7 + $0x18] sm:$0xff] }
 0x3c4   :  { %v915_v56 = vmul.f32 %v2108_v11, %v880_v37  ;;  %v916_v35 = vmul.f32 %v2114_v54, %v880_v37  ;;  %v2338_v30 = vsub.s32 2, %v1893_v47  ;;  %v2339_v33 = vsub.s32 3, %v1893_v47  ;;  %v1102_v37 = vld [vmem:[#allocation7 + $0x28] sm:$0xff] }
 0x3c5   :  { %971 = vperm.xlu0 %1556, %v921_v20   ;;  %931 = vperm.xlu1 %1555, %v913_v57   ;;  %v922_v54 = vmul.f32 %v2148_v10, %v892_v23  ;;  %v1081_v10 = vld [vmem:[%s2328_s6] sm:$0xff]  ;;  %v928_v47 = vmul.f32 %v2157_v3, %v904_v32  ;;  %v1086_v3 = vld [vmem:[%s2328_s6 + $0x28] sm:$0xff]  ;;  %v1533_v23 = vpack.c.bf16 %v1090_v38, %v1089_v4  ;;  %v1091_v20 = vld [vmem:[%s2328_s6 + $0x50] sm:$0xff] }
 0x3c6   :  { %v884_v53 = vrot.slane %v1590_v43, %v2338_v30  ;;  %v888_v5 = vrot.slane %v1590_v43, %v2339_v33  ;;  %v1527_v29 = vpack.c.bf16 %v1086_v3, %v1085_v45  ;;  %v1099_v43 = vld [vmem:[#allocation7 + $0x10] sm:$0xff]  ;;  %v1095_v33 = vld [vmem:[%s2328_s6 + $0x70] sm:$0xff] }
 0x3c7   :  { %v1092_v57 = vld [vmem:[%s2328_s6 + $0x58] sm:$0xff]  ;;  %v1512_v32 = vpack.c.bf16 %v1100_v46, %v1099_v43 }
 0x3c8   :  { %v917_v9 = vmul.f32 %v2121_v63, %v884_v53  ;;  %v918_v18 = vmul.f32 %v2128_v1, %v884_v53  ;;  %v919_v36 = vmul.f32 %v2136_v24, %v888_v5  ;;  %v920_v11 = vmul.f32 %v2141_v28, %v888_v5  ;;  %v1096_v5 = vld [vmem:[%s2328_s6 + $0x78] sm:$0xff] }
 0x3c9   :  { %1001 = vperm.xlu0 %1556, %v927_v49   ;;  %936 = vperm.xlu1 %1555, %v914_v40   ;;  %v923_v63 = vmul.f32 %v2117_v13, %v896_v19  ;;  %v924_v1 = vmul.f32 %v2151_v44, %v896_v19  ;;  %v925_v24 = vmul.f32 %v2124_v15, %v900_v55  ;;  %v1082_v13 = vld [vmem:[%s2328_s6 + $0x8] sm:$0xff]  ;;  %v2342_v44 = vmov 0.0|0.0   ;;  %v1083_v15 = vld [vmem:[%s2328_s6 + $0x10] sm:$0xff] }
 0x3ca   :  { %v926_v28 = vmul.f32 %v2154_v6, %v900_v55  ;;  %v1521_v17 = vpack.c.bf16 %v1082_v13, %v1081_v10  ;;  %v1084_v6 = vld [vmem:[%s2328_s6 + $0x18] sm:$0xff]  ;;  %1511 = vmatprep.subr.bf16.mxu0 %v2342_v44  ;;  %v1536_v49 = vpack.c.bf16 %v1092_v57, %v1091_v20  ;;  %v1101_v40 = vld [vmem:[#allocation7 + $0x20] sm:$0xff] }
 0x3cb   :  { %v1524_v60 = vpack.c.bf16 %v1084_v6, %v1083_v15  ;;  %1513 = vmatpush3.bf16.msra.mxu0 %v1512_v32  ;;  %v1515_v30 = vpack.c.bf16 %v1102_v37, %v1101_v40 }
 0x3cc   :  { %1522 = vmatpush3.bf16.msra.mxu1 %v1521_v17  ;;  %1514 = vmatprep.subr.bf16.mxu0 %v2342_v44 }
 0x3cd   :  { %941 = vperm.xlu1 %1555, %v915_v56   ;;  %1523 = vmatprep.subr.bf16.mxu1 %v2342_v44  ;;  %v1093_v56 = vld [vmem:[%s2328_s6 + $0x60] sm:$0xff] }
 0x3cf   :  { %1516 = vmatpush3.bf16.msra.mxu0 %v1515_v30 }
 0x3d0   :  { %1525 = vmatpush3.bf16.msra.mxu1 %v1524_v60  ;;  %1517 = vmatprep.subr.bf16.mxu0 %v2342_v44 }
 0x3d1   :  { %946 = vperm.xlu1 %1555, %v916_v35   ;;  %1526 = vmatprep.subr.bf16.mxu1 %v2342_v44  ;;  %v1094_v35 = vld [vmem:[%s2328_s6 + $0x68] sm:$0xff] }
 0x3d2   :  { %v1539_v53 = vpack.c.bf16 %v1094_v35, %v1093_v56 }
 0x3d4   :  { %1528 = vmatpush3.bf16.msra.mxu1 %v1527_v29 }
 0x3d5   :  { %951 = vperm.xlu1 %1555, %v917_v9   ;;  %1529 = vmatprep.subr.bf16.mxu1 %v2342_v44  ;;  %v1103_v9 = vld [vmem:[#allocation7 + $0x30] sm:$0xff] }
 0x3d8   :  { %1531 = vmatpush3.bf16.msra.mxu1 %v1530_v41 }
 0x3d9   :  { %956 = vperm.xlu1 %1555, %v918_v18   ;;  %1532 = vmatprep.subr.bf16.mxu1 %v2342_v44  ;;  %v1104_v18 = vld [vmem:[#allocation7 + $0x38] sm:$0xff] }
 0x3dc   :  { %1534 = vmatpush3.bf16.msra.mxu1 %v1533_v23 }
 0x3dd   :  { %961 = vperm.xlu1 %1555, %v919_v36   ;;  %1535 = vmatprep.subr.bf16.mxu1 %v2342_v44  ;;  %v1518_v36 = vpack.c.bf16 %v1104_v18, %v1103_v9 }
 0x3df   :  { %1519 = vmatpush3.bf16.msra.mxu0 %v1518_v36 }
 0x3e0   :  { %1537 = vmatpush3.bf16.msra.mxu1 %v1536_v49 }
 0x3e1   :  { %966 = vperm.xlu1 %1555, %v920_v11   ;;  %1538 = vmatprep.subr.bf16.mxu1 %v2342_v44  ;;  %v1542_v11 = vpack.c.bf16 %v1096_v5, %v1095_v33 }
 0x3e2   :  { %1443 = vmatmul.mubr.msk.f32.vlgmr.msra.gmra.mrb[2].mxu0 %vm104_vm1, %v1822_v27 }
 0x3e4   :  { %1540 = vmatpush3.bf16.msra.mxu1 %v1539_v53 }
 0x3e5   :  { %976 = vperm.xlu1 %1555, %v922_v54   ;;  %1541 = vmatprep.subr.bf16.mxu1 %v2342_v44 }
 0x3e8   :  { %1543 = vmatpush3.bf16.msra.mxu1 %v1542_v11 }
 0x3e9   :  { %981 = vperm.xlu1 %1555, %v923_v63  }
 0x3ed   :  { %986 = vperm.xlu1 %1555, %v924_v1  }
 0x3f1   :  { %991 = vperm.xlu1 %1555, %v925_v24  }
 0x3f5   :  { %996 = vperm.xlu1 %1555, %v926_v28  }
 0x3f9   :  { %1006 = vperm.xlu1 %1555, %v928_v47  }
 0x444   :  { %v932_v54 = vpop.permute.xlu1 %931  ;;  %v972_v17 = vpop.permute.xlu0 %971 }
 0x445   :  { %v1009_v45 = vmul.f32 %v932_v54, %v1908_v61 }
 0x448   :  { %v937_v58 = vpop.permute.xlu1 %936  ;;  %v1002_v40 = vpop.permute.xlu0 %1001 }
 0x449   :  { %v1010_v47 = vmul.f32 %v937_v58, %v1917_v7  ;;  %v1023_v18 = vmul.f32 %v1002_v40, %v1969_v59 }
 0x44b   :  { %v1025_v48 = vadd.f32 %v1010_v47, %v1009_v45 }
 0x44c   :  { %v942_v19 = vpop.permute.xlu1 %941 }
 0x44d   :  { %v1011_v44 = vmul.f32 %v942_v19, %v1912_v2 }
 0x450   :  { %v947_v63 = vpop.permute.xlu1 %946 }
 0x451   :  { %v1012_v28 = vmul.f32 %v947_v63, %v1920_v8  ;;  %v1017_v8 = vmul.f32 %v972_v17, %v1942_v31 }
 0x453   :  { %v1032_v60 = vadd.f32 %v1012_v28, %v1011_v44 }
 0x454   :  { %v952_v1 = vpop.permute.xlu1 %951 }
 0x455   :  { %v1013_v15 = vmul.f32 %v952_v1, %v1924_v12  ;;  %v1033_v41 = vrot.slane %v1032_v60, 4 }
 0x457   :  { %v1034_v22 = vadd.f32 %v1033_v41, %v1032_v60 }
 0x458   :  { %v957_v0 = vpop.permute.xlu1 %956 }
 0x459   :  { %v1014_v10 = vmul.f32 %v957_v0, %v1928_v16  ;;  %v1035_v20 = vrot.slane %v1034_v22, 2 }
 0x45b   :  { %v1039_v16 = vadd.f32 %v1014_v10, %v1013_v15  ;;  %v1036_v30 = vadd.f32 %v1035_v20, %v1034_v22  ;;  %v1307_v22 = vld [vmem:[%s2330_s8] ss:$0 sm:$0xff] }
 0x45c   :  { %v962_v55 = vpop.permute.xlu1 %961 }
 0x45d   :  { %v1015_v3 = vmul.f32 %v962_v55, %v1933_v21  ;;  %v1040_v2 = vrot.slane %v1039_v16, 4  ;;  %v1037_v63 = vrot.slane %v1036_v30, 1 }
 0x45f   :  { %v1041_v21 = vadd.f32 %v1040_v2, %v1039_v16  ;;  %v1038_v17 = vadd.f32 %v1037_v63, %v1036_v30 }
 0x460   :  { %v967_v24 = vpop.permute.xlu1 %966 }
 0x461   :  { %v1016_v27 = vmul.f32 %v967_v24, %v1937_v25  ;;  %v1026_v25 = vrot.slane %v1025_v48, 4  ;;  %v1042_v32 = vrot.slane %v1041_v21, 2 }
 0x463   :  { %v1046_v14 = vadd.f32 %v1016_v27, %v1015_v3  ;;  %v1027_v31 = vadd.f32 %v1026_v25, %v1025_v48  ;;  %v1043_v33 = vadd.f32 %v1042_v32, %v1041_v21 }
 0x464   :  { %v977_v13 = vpop.permute.xlu1 %976 }
 0x465   :  { %v1018_v6 = vmul.f32 %v977_v13, %v1946_v34  ;;  %v1047_v51 = vrot.slane %v1046_v14, 4  ;;  %v1028_v37 = vrot.slane %v1027_v31, 2  ;;  %v1044_v55 = vrot.slane %v1043_v33, 1 }
 0x467   :  { %v1053_v7 = vadd.f32 %v1018_v6, %v1017_v8  ;;  %v1048_v43 = vadd.f32 %v1047_v51, %v1046_v14  ;;  %v1029_v36 = vadd.f32 %v1028_v37, %v1027_v31  ;;  %v1045_v27 = vadd.f32 %v1044_v55, %v1043_v33 }
 0x468   :  { %v982_v29 = vpop.permute.xlu1 %981 }
 0x469   :  { %v1019_v12 = vmul.f32 %v982_v29, %v1951_v39  ;;  %v1054_v61 = vrot.slane %v1053_v7, 4  ;;  %v1049_v56 = vrot.slane %v1048_v43, 2 }
 0x46b   :  { %v1055_v46 = vadd.f32 %v1054_v61, %v1053_v7  ;;  %v1050_v11 = vadd.f32 %v1049_v56, %v1048_v43 }
 0x46c   :  { %v987_v26 = vpop.permute.xlu1 %986 }
 0x46d   :  { %v1020_v34 = vmul.f32 %v987_v26, %v1955_v42  ;;  %v1056_v35 = vrot.slane %v1055_v46, 2  ;;  %v1051_v24 = vrot.slane %v1050_v11, 1 }
 0x46f   :  { %v1060_v4 = vadd.f32 %v1020_v34, %v1019_v12  ;;  %v1057_v19 = vadd.f32 %v1056_v35, %v1055_v46  ;;  %v1052_v6 = vadd.f32 %v1051_v24, %v1050_v11 }
 0x470   :  { %v992_v38 = vpop.permute.xlu1 %991 }
 0x471   :  { %v1061_v23 = vrot.slane %v1060_v4, 4  ;;  %v1021_v39 = vmul.f32 %v992_v38, %v1960_v50  ;;  %v1058_v13 = vrot.slane %v1057_v19, 1 }
 0x473   :  { %v1062_v57 = vadd.f32 %v1061_v23, %v1060_v4  ;;  %v1059_v60 = vadd.f32 %v1058_v13, %v1057_v19 }
 0x474   :  { %v997_v49 = vpop.permute.xlu1 %996 }
 0x475   :  { %v1022_v42 = vmul.f32 %v997_v49, %v1964_v52  ;;  %v1063_v53 = vrot.slane %v1062_v57, 2  ;;  %v1030_v52 = vrot.slane %v1029_v36, 1 }
 0x477   :  { %v1067_v9 = vadd.f32 %v1022_v42, %v1021_v39  ;;  %v1064_v1 = vadd.f32 %v1063_v53, %v1062_v57  ;;  %v1031_v15 = vadd.f32 %v1030_v52, %v1029_v36 }
 0x478   :  { %v1007_v5 = vpop.permute.xlu1 %1006 }
 0x479   :  { %v1068_v54 = vrot.slane %v1067_v9, 4  ;;  %v1024_v58 = vmul.f32 %v1007_v5, %v1973_v62  ;;  %v1065_v59 = vrot.slane %v1064_v1, 1  ;;  %v1183_v3 = vsel %vm616_vm3, %v1038_v17, %v1031_v15 }
 0x47a   :  { %v1184_v29 = vsel %vm618_vm4, %v1045_v27, %v1183_v3 }
 0x47b   :  { %v1069_v0 = vadd.f32 %v1068_v54, %v1067_v9  ;;  %v1074_v50 = vadd.f32 %v1024_v58, %v1023_v18  ;;  %v1066_v8 = vadd.f32 %v1065_v59, %v1064_v1  ;;  %v1185_v14 = vsel %vm620_vm5, %v1052_v6, %v1184_v29 }
 0x47c   :  { %v1186_v41 = vsel %vm622_vm6, %v1059_v60, %v1185_v14 }
 0x47d   :  { %v1070_v28 = vrot.slane %v1069_v0, 2  ;;  %v1075_v10 = vrot.slane %v1074_v50, 4  ;;  %v1187_v26 = vsel %vm624_vm7, %v1066_v8, %v1186_v41 }
 0x47f   :  { %v1071_v47 = vadd.f32 %v1070_v28, %v1069_v0  ;;  %v1076_v44 = vadd.f32 %v1075_v10, %v1074_v50 }
 0x481   :  { %v1072_v45 = vrot.slane %v1071_v47, 1  ;;  %v1077_v62 = vrot.slane %v1076_v44, 2 }
 0x483   :  { %v1078_v16 = vadd.f32 %v1077_v62, %v1076_v44  ;;  %v1073_v48 = vadd.f32 %v1072_v45, %v1071_v47 }
 0x485   :  { %v1079_v7 = vrot.slane %v1078_v16, 1  ;;  %v1188_v25 = vsel %vm626_vm8, %v1073_v48, %v1187_v26 }
 0x487   :  { %v1080_v2 = vadd.f32 %v1079_v7, %v1078_v16 }
 0x489   :  { %v1189_v51 = vsel %vm628_vm9, %v1080_v2, %v1188_v25 }
 0x48a   :  { %1478 = vmatmul.mubr.f32.vlgmr.msra.gmra.mrb[16].mxu1 %v1189_v51 }
 0x4b5   :  { %v1171_v12 = vpop.f32.mrb[2].mxu0 }
 0x4b6   :  { %v1444_v34 = vpop.f32.mrb[3].mxu0 }
 0x55d   :  { %v1257_v61 = vpop.f32.mrb[16].mxu1 }
 0x55e   :  { %v1258_v4 = vadd.f32 %v1257_v61, %v1171_v12  ;;  %v1479_v21 = vpop.f32.mrb[17].mxu1 }
 0x560   :  { %v1268_v38 = vadd.f32 %v1307_v22, %v1258_v4 }
 0x562   :  { %v1269_v31 = vmax.f32 %v1268_v38, 0.0 }
 0x564   :  { %1270 = vst.msk [vmem:[#allocation8] sm:$0xff] %vm104_vm1, %v1269_v31 }
 0x565   :  { %1668 = shalt.err (!%p1665_p0)
}
 0x566   :  { %s1669_s8 = scalar_lea.hbm %s2331_s9, 128 }
 0x567   :  { %p1670_p1 = scmp.ne.s32.totalorder %s2331_s9, %s1669_s8  ;;  %p1673_p2 = scmp.lt.u32.totalorder %s1669_s8, %s2331_s9 }
 0x569   :  { %p1675_p3 = pnand %p1673_p2, %p1670_p1 }
 0x56b   :  { %1678 = shalt.err (!%p1675_p3)
}
 0x56c   :  { %1280 = dma.vmem_to_hbm [thread:$0]  %s1278_s19, 128, %s2331_s9, [#allocation4]  }
 0x56d   :  { %1683 = dma.done.wait [#allocation4], 128  }
 0x56e   :  { %1684 = vsyncadd [#allocation4], 4294967168 }
 0x56f   :  { %1284 = vsyncpa [#allocation3], 1 }
 0x570   :  { %1285 = vsyncpa [#allocation6], 1 }
 0x571   :  { %1286 = vsyncpa [#allocation4], 1 }

</bundles_post_ra>
